<compile_context>
chip_gen: v7x
topology: tpu7x:2x2x1
jax: 0.10.0
libtpu: 0.0.40
codegen_flags: <defaults>
</compile_context>

<pallas_src>
import functools

import jax
import jax.numpy as jnp
from jax.experimental import pallas as pl
from jax.experimental.pallas import tpu as pltpu


def _ls_ce_kernel(x_ref, t_ref, out_ref, *, smoothing, n_valid, tile_n):
    # NOTE: `smoothing` is baked in as a static constant (fixed hyperparameter);
    # pass it as an SMEM scalar if it must vary at runtime.
    confidence = 1.0 - smoothing

    x = x_ref[...].astype(jnp.float32)                       # (tile_n, C)
    tn, c = x.shape
    inv_c = 1.0 / float(c)

    t = t_ref[...]                                           # (tile_n, 1) int32
    col = jax.lax.broadcasted_iota(jnp.int32, (1, c), 1)     # (1, C), broadcast

    # ---- Pass 1 over raw x (no z tile kept live) -------------------------
    m = jnp.max(x, axis=-1, keepdims=True)                   # (tile_n, 1)
    # x at the target class via compare+select (one-hot gather, no f32 onehot).
    x_t = jnp.sum(jnp.where(col == t, x, 0.0), axis=-1, keepdims=True)
    sum_x = jnp.sum(x, axis=-1, keepdims=True)

    # ---- Pass 2: exactly one exp per element -----------------------------
    lse = jnp.log(jnp.sum(jnp.exp(x - m), axis=-1, keepdims=True))  # (tile_n, 1)

    nll = (lse + m) - x_t                                    # -logprob[target]
    smooth = (lse + m) - sum_x * inv_c                       # -mean(logprob)
    loss = confidence * nll + smoothing * smooth             # (tile_n, 1)

    # Mask rows past the true batch size (partial last tile reads garbage;
    # any NaN/Inf produced there is per-row and discarded by this select).
    row = jax.lax.broadcasted_iota(jnp.int32, (tn, 1), 0)
    global_row = pl.program_id(0) * tile_n + row
    loss = jnp.where(global_row < n_valid, loss, 0.0)

    # Per-tile partial sum, broadcast across 128 lanes (lane-dense store).
    tile_sum = jnp.sum(loss, keepdims=True)                  # (1, 1)
    out_ref[...] = jnp.broadcast_to(tile_sum, out_ref.shape).astype(jnp.float32)


def _round_up(v, m):
    return ((v + m - 1) // m) * m


def _vmem_capacity_bytes():
    try:
        return int(pltpu.get_tpu_info().vmem_capacity_bytes)
    except Exception:
        return 64 << 20        # conservative (v7x per-TC)


def _choose_tile_n(n, c, itemsize, sublane, vmem_cap):
    # Sizing budget: input tile is double-buffered by BlockSpec pipelining;
    # the f32 upcast / exp intermediates add roughly three f32 copies of the
    # tile live at once (conservative estimate).
    budget = max(4 << 20, min(20 << 20, vmem_cap // 5))       # ~12.8 MiB v7x, 20 MiB v5e/v6e
    per_row = 2 * c * itemsize + 3 * c * 4 + 2 * 128 * 4
    vmem_rows = budget // max(per_row, 1)
    # Target ~4 MiB of input per buffer so the ~0.35 us per-step overhead
    # amortizes (small-vocab cases would otherwise get tiny blocks).
    target_rows = (4 << 20) // max(c * itemsize, 1)
    # Keep >= ~8 grid steps when N allows: megacore occupancy on v7x (2 TCs)
    # plus pipeline depth.
    occupancy_rows = -(-n // 8)
    tile = max(sublane, min(vmem_rows, target_rows, max(occupancy_rows, sublane)))
    tile = max(sublane, (tile // sublane) * sublane)
    return min(tile, _round_up(n, sublane))


def label_smoothing_cross_entropy(x, target, smoothing=0.1):
    """x: (N, C) float logits (f32 or bf16), target: (N,) int class ids.

    Returns a scalar float32 loss (mean over rows).
    """
    assert smoothing < 1.0
    n, c = x.shape
    itemsize = jnp.dtype(x.dtype).itemsize
    sublane = max(8, 32 // itemsize)            # 8 for f32, 16 for bf16

    vmem_cap = _vmem_capacity_bytes()
    tile_n = _choose_tile_n(n, c, itemsize, sublane, vmem_cap)
    num_tiles = pl.cdiv(n, tile_n)

    # No padding / copying of the logits: the class block dim equals the full
    # array dim, and the (possibly partial) last row tile is masked in-kernel.
    t_p = target.astype(jnp.int32).reshape(-1, 1)

    kernel = functools.partial(
        _ls_ce_kernel,
        smoothing=float(smoothing),
        n_valid=n,
        tile_n=tile_n,
    )

    partials = pl.pallas_call(
        kernel,
        out_shape=jax.ShapeDtypeStruct((num_tiles, 128), jnp.float32),
        grid=(num_tiles,),
        in_specs=[
            pl.BlockSpec((tile_n, c), lambda i: (i, 0)),
            pl.BlockSpec((tile_n, 1), lambda i: (i, 0)),
        ],
        out_specs=pl.BlockSpec((1, 128), lambda i: (i, 0)),
        compiler_params=pltpu.CompilerParams(
            dimension_semantics=("parallel",),
            # ~40 MiB on v7x (64 MiB/TC), ~80 MiB on v5e/v6e (128 MiB).
            vmem_limit_bytes=min(int(vmem_cap * 5 // 8), 96 << 20),
        ),
    )(x, t_p)

    # Tiny final reduction in plain JAX: sum of per-tile partials / true N.
    return jnp.sum(partials[:, 0]) / n


def _reference(x, target, smoothing=0.1):
    logprobs = jax.nn.log_softmax(x.astype(jnp.float32), axis=-1)
    nll = -jnp.take_along_axis(logprobs, target[:, None], axis=-1)[:, 0]
    smooth = -jnp.mean(logprobs, axis=-1)
    return jnp.mean((1.0 - smoothing) * nll + smoothing * smooth)


if __name__ == "__main__":
    key = jax.random.PRNGKey(0)
    kx, kt, kx2, kt2 = jax.random.split(key, 4)

    # Small case: C not a multiple of 128 (exercises full-C lane handling).
    N, C = 8, 32
    x = jax.random.normal(kx, (N, C), dtype=jnp.float32)
    target = jax.random.randint(kt, (N,), 0, C, dtype=jnp.int32)

    loss = label_smoothing_cross_entropy(x, target, smoothing=0.1)
    loss = jax.block_until_ready(loss)
    ref = _reference(x, target, smoothing=0.1)
    assert jnp.allclose(loss, ref, atol=1e-5, rtol=1e-5), (loss, ref)

    # Unaligned case exercising a partial last row tile + non-128 class count,
    # with no wrapper-side padding at all.
    N2, C2 = 50, 200
    x2 = jax.random.normal(kx2, (N2, C2), dtype=jnp.float32)
    target2 = jax.random.randint(kt2, (N2,), 0, C2, dtype=jnp.int32)

    loss2 = label_smoothing_cross_entropy(x2, target2, smoothing=0.1)
    loss2 = jax.block_until_ready(loss2)
    ref2 = _reference(x2, target2, smoothing=0.1)
    assert jnp.allclose(loss2, ref2, atol=1e-5, rtol=1e-5), (loss2, ref2)

    print("KERNEL_OK")
</pallas_src>

<mosaic_0001>
module attributes {stable_mosaic.version = 11 : i64} {
  func.func @_ls_ce_kernel(%arg0: i32, %arg1: memref<8x32xf32, #tpu.memory_space<vmem>>, %arg2: memref<8x1xi32, #tpu.memory_space<vmem>>, %arg3: memref<1x128xf32, #tpu.memory_space<vmem>>) attributes {dimension_semantics = [#tpu.dimension_semantics<parallel>], iteration_bounds = array<i64: 1>, scalar_prefetch = 0 : i64, scratch_operands = 0 : i64, tpu.core_type = #tpu.core_type<tc>, window_params = [{transform_indices = @transform_0, window_bounds = array<i64: 8, 32>}, {transform_indices = @transform_1, window_bounds = array<i64: 8, 1>}, {transform_indices = @transform_2, window_bounds = array<i64: 1, 128>}]} {
    %c0 = arith.constant 0 : index
    %c0_0 = arith.constant 0 : index
    %0 = vector.load %arg1[%c0, %c0_0] : memref<8x32xf32, #tpu.memory_space<vmem>>, vector<8x32xf32>
    %c0_1 = arith.constant 0 : index
    %c0_2 = arith.constant 0 : index
    %1 = vector.load %arg2[%c0_1, %c0_2] : memref<8x1xi32, #tpu.memory_space<vmem>>, vector<8x1xi32>
    %2 = tpu.iota {dimensions = array<i32: 1>} : vector<1x32xi32>
    %cst = arith.constant dense<0xFF800000> : vector<8xf32>
    %3 = vector.multi_reduction <maximumf>, %0, %cst [1] : vector<8x32xf32> to vector<8xf32>
    %4 = vector.shape_cast %3 : vector<8xf32> to vector<8x1xf32>
    %5 = vector.broadcast %2 : vector<1x32xi32> to vector<8x32xi32>
    %6 = vector.broadcast %1 : vector<8x1xi32> to vector<8x32xi32>
    %7 = arith.cmpi eq, %5, %6 : vector<8x32xi32>
    %cst_3 = arith.constant 0.000000e+00 : f32
    %8 = vector.broadcast %cst_3 : f32 to vector<8x32xf32>
    %9 = arith.select %7, %0, %8 : vector<8x32xi1>, vector<8x32xf32>
    %cst_4 = arith.constant dense<0.000000e+00> : vector<8xf32>
    %10 = vector.multi_reduction <add>, %9, %cst_4 [1] : vector<8x32xf32> to vector<8xf32>
    %11 = vector.shape_cast %10 : vector<8xf32> to vector<8x1xf32>
    %cst_5 = arith.constant dense<0.000000e+00> : vector<8xf32>
    %12 = vector.multi_reduction <add>, %0, %cst_5 [1] : vector<8x32xf32> to vector<8xf32>
    %13 = vector.shape_cast %12 : vector<8xf32> to vector<8x1xf32>
    %14 = vector.broadcast %4 : vector<8x1xf32> to vector<8x32xf32>
    %15 = arith.subf %0, %14 : vector<8x32xf32>
    %16 = math.exp %15 : vector<8x32xf32>
    %cst_6 = arith.constant dense<0.000000e+00> : vector<8xf32>
    %17 = vector.multi_reduction <add>, %16, %cst_6 [1] : vector<8x32xf32> to vector<8xf32>
    %18 = vector.shape_cast %17 : vector<8xf32> to vector<8x1xf32>
    %19 = math.log %18 : vector<8x1xf32>
    %20 = arith.addf %19, %4 : vector<8x1xf32>
    %21 = arith.subf %20, %11 : vector<8x1xf32>
    %22 = arith.addf %19, %4 : vector<8x1xf32>
    %cst_7 = arith.constant 3.125000e-02 : f32
    %23 = vector.broadcast %cst_7 : f32 to vector<8x1xf32>
    %24 = arith.mulf %13, %23 : vector<8x1xf32>
    %25 = arith.subf %22, %24 : vector<8x1xf32>
    %cst_8 = arith.constant 0.899999976 : f32
    %26 = vector.broadcast %cst_8 : f32 to vector<8x1xf32>
    %27 = arith.mulf %26, %21 : vector<8x1xf32>
    %cst_9 = arith.constant 1.000000e-01 : f32
    %28 = vector.broadcast %cst_9 : f32 to vector<8x1xf32>
    %29 = arith.mulf %28, %25 : vector<8x1xf32>
    %30 = arith.addf %27, %29 : vector<8x1xf32>
    %31 = tpu.iota {dimensions = array<i32: 0>} : vector<8x1xi32>
    %c8_i32 = arith.constant 8 : i32
    %32 = arith.muli %arg0, %c8_i32 : i32
    %33 = vector.broadcast %32 : i32 to vector<8x1xi32>
    %34 = arith.addi %33, %31 : vector<8x1xi32>
    %c8_i32_10 = arith.constant 8 : i32
    %35 = vector.broadcast %c8_i32_10 : i32 to vector<8x1xi32>
    %36 = arith.cmpi slt, %34, %35 : vector<8x1xi32>
    %cst_11 = arith.constant 0.000000e+00 : f32
    %37 = vector.broadcast %cst_11 : f32 to vector<8x1xf32>
    %38 = arith.select %36, %30, %37 : vector<8x1xi1>, vector<8x1xf32>
    %39 = vector.shape_cast %38 : vector<8x1xf32> to vector<1x8x1xf32>
    %cst_12 = arith.constant dense<0.000000e+00> : vector<1xf32>
    %40 = vector.multi_reduction <add>, %39, %cst_12 [1, 2] : vector<1x8x1xf32> to vector<1xf32>
    %41 = vector.shape_cast %40 : vector<1xf32> to vector<1x1x1xf32>
    %42 = vector.extract %41[0, 0, 0] : f32 from vector<1x1x1xf32>
    %43 = vector.broadcast %42 : f32 to vector<1x1xf32>
    %44 = vector.shape_cast %43 : vector<1x1xf32> to vector<1x1xf32>
    %45 = vector.broadcast %44 : vector<1x1xf32> to vector<1x128xf32>
    %c0_13 = arith.constant 0 : index
    %c0_14 = arith.constant 0 : index
    %46 = vector.load %arg3[%c0_13, %c0_14] : memref<1x128xf32, #tpu.memory_space<vmem>>, vector<1x128xf32>
    tpu.vector_store %arg3[%c0_13, %c0_14], %45 {strides = array<i32>} : memref<1x128xf32, #tpu.memory_space<vmem>>, vector<1x128xf32>,
    return
  }
  func.func @transform_0(%arg0: i32) -> (i32, i32) {
    %c0_i32 = arith.constant 0 : i32
    %c0_i32_0 = arith.constant 0 : i32
    return %arg0, %c0_i32 : i32, i32
  }
  func.func @transform_1(%arg0: i32) -> (i32, i32) {
    %c0_i32 = arith.constant 0 : i32
    %c0_i32_0 = arith.constant 0 : i32
    return %arg0, %c0_i32 : i32, i32
  }
  func.func @transform_2(%arg0: i32) -> (i32, i32) {
    %c0_i32 = arith.constant 0 : i32
    %c0_i32_0 = arith.constant 0 : i32
    return %arg0, %c0_i32 : i32, i32
  }
}

</mosaic_0001>

<bundles_post_ra>
// kernel: tpu_custom_call.1
= control target key start
LH: loop header
LB: loop body
LE: loop exit
PB: predicated region body
PF: predicated region fallthrough
CT: control target
= control target key end

     0   :  { %vm16_vm0 = vcmask 261120   ;;  %s152_s0 = inlined_call_operand.vmem [shape: f32[8,32], index: 0, kind: input, shape index: {}]   ;;  %s153_s1 = inlined_call_operand.vmem [shape: s32[8,1], index: 1, kind: input, shape index: {}]   ;;  %s154_s2 = inlined_call_operand.hbm [shape: f32[1,128], index: 2, kind: output, shape index: {}]  }
   0x1   :  { %v12_v0 = vld [vmem:[%s152_s0] sm:$0xff] }
   0x2   :  { %7 = vsyncpa [#allocation3], 0  ;;  %v17_v1 = vsel %vm16_vm0, %v12_v0, -inf  ;;  %v113_v2 = vmov 0   ;;  %v13_v3 = vld [vmem:[%s153_s1] sm:$0xff]  ;;  %v14_v7 = vlaneseq  ;;  %v28_v12 = vsel %vm16_vm0, %v12_v0, 0.0 }
   0x3   :  { %84 = vset.pattern.permute.xlu0 %v113_v2  ;;  %vm53_vm2 = vcmask 7168   ;;  %s114_s0 = smov [#allocation2]  }
   0x4   :  { %18 = vmax.xlane.f32.xlu0 %v17_v1  ;;  %v15_v8 = vand.u32 127, %v14_v7  ;;  %s72_s1 = sshll.u32 %s114_s0, 4  ;;  %s73_s1 = int_to_ptr.vmem [resolvable:$true] %s72_s1 }
   0x5   :  { %s89_s14 = scalar_lea.vmem %s73_s1, 16  ;;  %s93_s15 = scalar_lea.vmem %s73_s1, 32 }
   0x6   :  { %p90_p0 = scmp.ne.s32.totalorder %s73_s1, %s89_s14  ;;  %p94_p1 = scmp.lt.s32.totalorder %s73_s1, %s73_s1 }
   0x7   :  { %p95_p2 = scmp.lt.s32.totalorder %s93_s15, %s89_s14 }
   0x9   :  { %p96_p3 = por %p95_p2, %p94_p1 }
   0xb   :  { %p97_p4 = pnand %p96_p3, %p90_p0 }
  0x1a   :  { %21 = vperm.xlu0 %84, %v13_v3  }
  0x91   :  { %v19_v4 = vpop.xlane.xlu0 %18 }
  0x92   :  { %v31_v5 = vsub.f32 %v12_v0, %v19_v4 }
  0x94   :  { %v32_v6 = vmul.f32 1.442695, %v31_v5 }
  0x96   :  { %85 = vpow2.f32 %v32_v6 }
  0x99   :  { %v22_v9 = vpop.permute.xlu0 %21 }
  0x9a   :  { %vm23_vm1 = vcmp.eq.s32.totalorder %v15_v8, %v22_v9 }
  0x9b   :  { %v24_v13 = vsel %vm23_vm1, %v12_v0, 0.0 }
  0x9c   :  { %v25_v14 = vsel %vm16_vm0, %v24_v13, 0.0 }
  0xa0   :  { %v86_v10 = vpop.eup %85 }
  0xa1   :  { %v34_v11 = vsel %vm16_vm0, %v86_v10, 0.0 }
  0xa2   :  { %35 = vadd.xlane.f32.xlu1 %v34_v11 }
  0xa6   :  { %29 = vadd.xlane.f32.xlu1 %v28_v12 }
  0xaa   :  { %26 = vadd.xlane.f32.xlu1 %v25_v14 }
 0x12f   :  { %v36_v15 = vpop.xlane.xlu1 %35 }
 0x130   :  { %87 = vlog2.f32 %v36_v15 }
 0x133   :  { %v30_v16 = vpop.xlane.xlu1 %29 }
 0x134   :  { %v41_v21 = vmul.f32 0.03125, %v30_v16 }
 0x137   :  { %v27_v19 = vpop.xlane.xlu1 %26 }
 0x13a   :  { %v88_v17 = vpop.eup %87 }
 0x13b   :  { %v38_v18 = vmul.f32 0.6931472, %v88_v17 }
 0x13d   :  { %v39_v20 = vadd.f32 %v38_v18, %v19_v4 }
 0x13f   :  { %v42_v22 = vsub.f32 %v39_v20, %v41_v21  ;;  %v40_v23 = vsub.f32 %v39_v20, %v27_v19 }
 0x141   :  { %v44_v24 = vmul.f32 0.1, %v42_v22  ;;  %v43_v25 = vmul.f32 0.9, %v40_v23 }
 0x143   :  { %v45_v26 = vadd.f32 %v44_v24, %v43_v25 }
 0x145   :  { %v54_v27 = vsel %vm53_vm2, %v45_v26, 0.0 }
 0x146   :  { %55 = vadd.xlane.f32.xlu1 %v54_v27 }
 0x1d3   :  { %v56_v28 = vpop.xlane.xlu1 %55 }
 0x1d4   :  { %v57_v29 = vrot.slane %v56_v28, 4 }
 0x1d6   :  { %v58_v30 = vadd.f32 %v57_v29, %v56_v28 }
 0x1d8   :  { %v59_v31 = vrot.slane %v58_v30, 2 }
 0x1da   :  { %v60_v32 = vadd.f32 %v59_v31, %v58_v30 }
 0x1dc   :  { %v61_v33 = vrot.slane %v60_v32, 1 }
 0x1de   :  { %v62_v34 = vadd.f32 %v61_v33, %v60_v32 }
 0x1e0   :  { %80 = vpush %v62_v34 }
 0x211   :  { %s81_s13 = spop %80 }
 0x212   :  { %v64_v35 = vstv %s81_s13 }
 0x213   :  { %65 = vst [vmem:[#allocation2] sm:$0x1] %v64_v35 }
 0x214   :  { %100 = shalt.err (!%p97_p4)
}
 0x215   :  { %s101_s18 = scalar_lea.hbm %s154_s2, 16 }
 0x216   :  { %p102_p5 = scmp.ne.s32.totalorder %s154_s2, %s101_s18  ;;  %p105_p6 = scmp.lt.u32.totalorder %s101_s18, %s154_s2 }
 0x218   :  { %p107_p7 = pnand %p105_p6, %p102_p5 }
 0x21a   :  { %110 = shalt.err (!%p107_p7)
}
 0x21b   :  { %75 = dma.vmem_to_hbm [thread:$0]  %s73_s1, 16, %s154_s2, [#allocation3]  }
 0x21c   :  { %111 = dma.done.wait [#allocation3], 16  }
 0x21d   :  { %112 = vsyncadd [#allocation3], 4294967280 }
 0x21e   :  { %79 = vsyncpa [#allocation3], 1 }

</bundles_post_ra>
